<compile_context>
chip_gen: v7x
topology: tpu7x:2x2x1
jax: 0.10.0
libtpu: 0.0.40
codegen_flags: <defaults>
</compile_context>

<pallas_src>
import jax
import jax.numpy as jnp
from jax import lax
from jax.experimental import pallas as pl
from jax.experimental.pallas import tpu as pltpu


# --------------------------------------------------------------------------
# Activation registry (mirrors Activation(act_type) in the reference module).
# --------------------------------------------------------------------------
def _activation(name):
    name = name.lower()
    if name == "relu":
        return lambda v: jnp.maximum(v, 0.0)
    if name == "relu6":
        return lambda v: jnp.clip(v, 0.0, 6.0)
    if name in ("silu", "swish"):
        return jax.nn.silu
    if name in ("hardswish", "hard_swish"):
        return jax.nn.hard_swish
    if name == "gelu":
        return jax.nn.gelu
    if name == "sigmoid":
        return jax.nn.sigmoid
    if name in ("identity", "none", "linear"):
        return lambda v: v
    raise ValueError(f"unsupported act_type: {name}")


# --------------------------------------------------------------------------
# Chip detection: VMEM capacity + whether a "parallel" grid axis is sharded
# across multiple TensorCores.
# --------------------------------------------------------------------------
def _chip_info():
    vmem_bytes = 64 * 1024 * 1024  # conservative default (v7x floor)
    try:
        vmem_bytes = int(pltpu.get_tpu_info().vmem_capacity_bytes)
    except Exception:
        pass
    kind = ""
    try:
        kind = jax.devices()[0].device_kind.lower()
    except Exception:
        pass
    # Dual-TC chips (megacore / v7x) benefit from an even parallel grid extent;
    # v5e/v6e have a single TensorCore.
    multi_tc = any(tag in kind for tag in ("v4", "v5p", "v7"))
    if "v7" in kind:
        vmem_bytes = min(vmem_bytes, 64 * 1024 * 1024)  # per-TC VMEM on v7x
    return vmem_bytes, (2 if multi_tc else 1)


# --------------------------------------------------------------------------
# Kernels.
# --------------------------------------------------------------------------
def _make_se_kernel(act_fn, n_total, batch_tile, hw_total):
    """Single-pass kernel: whole (batch_tile, C, HW) block resident in VMEM."""
    inv_hw = 1.0 / float(hw_total)

    def kernel(x_ref, w1t_ref, b1_ref, w2t_ref, b2_ref, o_ref):
        x = x_ref[...]                                          # (B, C, HW), input dtype
        # Global average pool: f32 accumulation, no full-block f32 copy kept.
        pooled = jnp.sum(x, axis=2, dtype=jnp.float32) * inv_hw  # (B, C) f32
        if n_total % batch_tile != 0:
            # Ragged last batch block: zero the garbage rows so exp/sigmoid on
            # uninitialized VMEM can't produce NaN/Inf (outputs are masked anyway).
            rem = n_total - pl.program_id(0) * batch_tile
            rows = lax.broadcasted_iota(jnp.int32, pooled.shape, 0)
            pooled = jnp.where(rows < rem, pooled, 0.0)
        # Linear(C -> S) + activation.
        h = jnp.dot(pooled, w1t_ref[...], preferred_element_type=jnp.float32)
        h = act_fn(h + b1_ref[...])                              # (B, S)
        # Linear(S -> C) + sigmoid gate.
        g = jnp.dot(h, w2t_ref[...], preferred_element_type=jnp.float32)
        g = jax.nn.sigmoid(g + b2_ref[...])                      # (B, C) f32
        # Gating in the input dtype (no f32 block temp / cast-back store).
        o_ref[...] = x * g.astype(x.dtype)[:, :, None]

    return kernel


def _make_pool_kernel(hw_total, hw_tile):
    """Phase 1 of the HW-tiled fallback: running f32 sum over HW chunks."""
    full_tiles = (hw_total % hw_tile == 0)

    def kernel(x_ref, sum_ref):
        h = pl.program_id(1)

        @pl.when(h == 0)
        def _():
            sum_ref[...] = jnp.zeros_like(sum_ref)

        x = x_ref[...]                                           # (B, C, hw_tile)
        if not full_tiles:
            lane = lax.broadcasted_iota(jnp.int32, x.shape, 2) + h * hw_tile
            x = jnp.where(lane < hw_total, x, jnp.zeros_like(x))
        sum_ref[...] += jnp.sum(x, axis=2, dtype=jnp.float32)[:, None, :]

    return kernel


def _make_apply_kernel(act_fn, n_total, batch_tile, hw_total):
    """Phase 2 of the HW-tiled fallback: compute gate once, apply per HW chunk."""
    inv_hw = 1.0 / float(hw_total)

    def kernel(sum_ref, w1t_ref, b1_ref, w2t_ref, b2_ref, x_ref, o_ref, g_ref):
        @pl.when(pl.program_id(1) == 0)
        def _():
            pooled = sum_ref[:, 0, :] * inv_hw                   # (B, C) f32
            if n_total % batch_tile != 0:
                rem = n_total - pl.program_id(0) * batch_tile
                rows = lax.broadcasted_iota(jnp.int32, pooled.shape, 0)
                pooled = jnp.where(rows < rem, pooled, 0.0)
            h = jnp.dot(pooled, w1t_ref[...], preferred_element_type=jnp.float32)
            h = act_fn(h + b1_ref[...])
            g = jnp.dot(h, w2t_ref[...], preferred_element_type=jnp.float32)
            g = jax.nn.sigmoid(g + b2_ref[...])
            g_ref[...] = g.astype(g_ref.dtype)

        x = x_ref[...]                                           # (B, C, hw_tile)
        o_ref[...] = x * g_ref[...][:, :, None]

    return kernel


# --------------------------------------------------------------------------
# Wrapper.
# --------------------------------------------------------------------------
def se_block(x, w1, b1, w2, b2, *, act_type="relu", batch_tile=None,
             hw_tile=None, vmem_limit_bytes=None):
    """SEBlock forward.

    x: (N, C, H, W); w1: (S, C); b1: (S,); w2: (C, S); b2: (C,).
    """
    N, C, H, W = x.shape
    S = w1.shape[0]
    HW = H * W
    itemsize = x.dtype.itemsize
    bytes_per_row = C * HW * itemsize                       # one batch element

    x2d = x.reshape(N, C, HW)                               # free for NCHW-contiguous
    w1t = w1.T                                              # (C, S)
    w2t = w2.T                                              # (S, C)
    b1_2d = b1.reshape(1, S)
    b2_2d = b2.reshape(1, C)
    act_fn = _activation(act_type)

    vmem_physical, num_tc = _chip_info()
    vmem_budget = min(vmem_physical * 3 // 4, 96 * 1024 * 1024)
    weight_bytes = (C * S * 2 + S + C) * 4
    overhead = 2 * weight_bytes + (4 << 20)                 # weights (dbl-buffered) + margin
    max_block_bytes = max(1, (vmem_budget - overhead) // 4)  # in+out, double-buffered
    target_block_bytes = min(8 << 20, max_block_bytes)      # 4-8 MiB class blocks

    two_phase = (hw_tile is not None) or (bytes_per_row > max_block_bytes)

    if not two_phase:
        # ------------------------- single-pass path -------------------------
        if batch_tile is None:
            batch_tile = max(1, min(N, target_block_bytes // max(1, bytes_per_row)))
            if num_tc >= 2 and N >= 2:
                # Dual-TC: keep the parallel grid extent even (balanced cores).
                grid_n = pl.cdiv(N, batch_tile)
                if grid_n % 2 != 0:
                    bt = pl.cdiv(N, grid_n + 1)
                    if pl.cdiv(N, bt) % 2 == 0:
                        batch_tile = bt
            # Single-TC chips (v5e/v6e): keep the largest block that fits.
        batch_tile = int(batch_tile)
        grid_n = pl.cdiv(N, batch_tile)

        if vmem_limit_bytes is None:
            block_bytes = batch_tile * bytes_per_row
            needed = 4 * block_bytes + 2 * weight_bytes + (4 << 20)
            vmem_limit_bytes = int(min(vmem_budget, max(needed, 16 << 20)))

        kernel = _make_se_kernel(act_fn, N, batch_tile, HW)
        out2d = pl.pallas_call(
            kernel,
            out_shape=jax.ShapeDtypeStruct((N, C, HW), x.dtype),
            grid_spec=pltpu.PrefetchScalarGridSpec(
                num_scalar_prefetch=0,
                grid=(grid_n,),
                in_specs=[
                    pl.BlockSpec((batch_tile, C, HW), lambda b: (b, 0, 0)),
                    pl.BlockSpec((C, S), lambda b: (0, 0)),   # resident weights
                    pl.BlockSpec((1, S), lambda b: (0, 0)),
                    pl.BlockSpec((S, C), lambda b: (0, 0)),
                    pl.BlockSpec((1, C), lambda b: (0, 0)),
                ],
                out_specs=pl.BlockSpec((batch_tile, C, HW), lambda b: (b, 0, 0)),
            ),
            compiler_params=pltpu.CompilerParams(
                dimension_semantics=("parallel",),
                vmem_limit_bytes=int(vmem_limit_bytes),
            ),
        )(x2d, w1t, b1_2d, w2t, b2_2d)
        return out2d.reshape(N, C, H, W)

    # --------------------- two-phase HW-tiled fallback -----------------------
    # For feature maps too large to hold (double-buffered) per batch element:
    # phase 1 pools over HW chunks (running f32 sum), phase 2 computes the gate
    # once per batch tile and applies it per HW chunk.
    if hw_tile is None:
        hw_tile = max(1, target_block_bytes // max(1, C * itemsize))
    hw_tile = int(min(int(hw_tile), HW))
    if hw_tile < HW:
        # Lane-axis block dim must be a multiple of 128 (or the full extent).
        hw_tile = max(128, (hw_tile // 128) * 128)
        hw_tile = min(hw_tile, HW)
        if hw_tile % 128 != 0 and hw_tile != HW:
            hw_tile = HW
    grid_hw = pl.cdiv(HW, hw_tile)

    if batch_tile is None:
        block_row_bytes = C * hw_tile * itemsize
        batch_tile = max(1, min(N, target_block_bytes // max(1, block_row_bytes)))
    batch_tile = int(batch_tile)
    grid_n = pl.cdiv(N, batch_tile)

    if vmem_limit_bytes is None:
        block_bytes = batch_tile * C * hw_tile * itemsize
        needed = 4 * block_bytes + 2 * weight_bytes + 8 * batch_tile * C * 4 + (4 << 20)
        vmem_limit_bytes = int(min(vmem_budget, max(needed, 16 << 20)))
    vmem_limit_bytes = int(vmem_limit_bytes)

    # Phase 1: pooled sums, (N, 1, C) f32 (output block is the accumulator).
    pool_kernel = _make_pool_kernel(HW, hw_tile)
    pooled_sum = pl.pallas_call(
        pool_kernel,
        out_shape=jax.ShapeDtypeStruct((N, 1, C), jnp.float32),
        grid_spec=pltpu.PrefetchScalarGridSpec(
            num_scalar_prefetch=0,
            grid=(grid_n, grid_hw),
            in_specs=[pl.BlockSpec((batch_tile, C, hw_tile), lambda b, h: (b, 0, h))],
            out_specs=pl.BlockSpec((batch_tile, 1, C), lambda b, h: (b, 0, 0)),
        ),
        compiler_params=pltpu.CompilerParams(
            dimension_semantics=("parallel", "arbitrary"),
            vmem_limit_bytes=vmem_limit_bytes,
        ),
    )(x2d)

    # Phase 2: gate (computed once per batch tile, cached in VMEM scratch) + apply.
    apply_kernel = _make_apply_kernel(act_fn, N, batch_tile, HW)
    out2d = pl.pallas_call(
        apply_kernel,
        out_shape=jax.ShapeDtypeStruct((N, C, HW), x.dtype),
        grid_spec=pltpu.PrefetchScalarGridSpec(
            num_scalar_prefetch=0,
            grid=(grid_n, grid_hw),
            in_specs=[
                pl.BlockSpec((batch_tile, 1, C), lambda b, h: (b, 0, 0)),
                pl.BlockSpec((C, S), lambda b, h: (0, 0)),
                pl.BlockSpec((1, S), lambda b, h: (0, 0)),
                pl.BlockSpec((S, C), lambda b, h: (0, 0)),
                pl.BlockSpec((1, C), lambda b, h: (0, 0)),
                pl.BlockSpec((batch_tile, C, hw_tile), lambda b, h: (b, 0, h)),
            ],
            out_specs=pl.BlockSpec((batch_tile, C, hw_tile), lambda b, h: (b, 0, h)),
            scratch_shapes=[pltpu.VMEM((batch_tile, C), x.dtype)],
        ),
        compiler_params=pltpu.CompilerParams(
            dimension_semantics=("parallel", "arbitrary"),
            vmem_limit_bytes=vmem_limit_bytes,
        ),
    )(pooled_sum, w1t, b1_2d, w2t, b2_2d, x2d)
    return out2d.reshape(N, C, H, W)


# --------------------------------------------------------------------------
# Pure-JAX reference.
# --------------------------------------------------------------------------
def se_block_ref(x, w1, b1, w2, b2, act_type="relu"):
    act = _activation(act_type)
    pooled = jnp.mean(x, axis=(2, 3))                        # (N, C)
    h = act(pooled @ w1.T + b1)                              # (N, S)
    g = jax.nn.sigmoid(h @ w2.T + b2)                        # (N, C)
    return x * g[:, :, None, None]


if __name__ == "__main__":
    # SEBlock(channels=16, reduction_ratio=0.25, act_type='relu')
    N, C, H, W = 2, 16, 8, 8
    reduction_ratio = 0.25
    S = int(C * reduction_ratio)                             # squeeze_channels = 4

    key = jax.random.PRNGKey(0)
    kx, kw1, kb1, kw2, kb2 = jax.random.split(key, 5)
    x = jax.random.normal(kx, (N, C, H, W), dtype=jnp.float32)
    w1 = jax.random.normal(kw1, (S, C), dtype=jnp.float32) * 0.1  # Linear(C, S).weight
    b1 = jax.random.normal(kb1, (S,), dtype=jnp.float32) * 0.1
    w2 = jax.random.normal(kw2, (C, S), dtype=jnp.float32) * 0.1  # Linear(S, C).weight
    b2 = jax.random.normal(kb2, (C,), dtype=jnp.float32) * 0.1

    # Main single-pass path (whole feature map per block).
    out = jax.block_until_ready(se_block(x, w1, b1, w2, b2, act_type="relu"))
    ref = se_block_ref(x, w1, b1, w2, b2, act_type="relu")
    assert out.shape == (N, C, H, W)
    assert jnp.allclose(out, ref, atol=1e-5, rtol=1e-5), "single-pass mismatch"

    # Also exercise the HW-tiled two-phase fallback path (used for large maps).
    H2 = W2 = 16
    x2 = jax.random.normal(kx, (N, C, H2, W2), dtype=jnp.float32)
    out2 = jax.block_until_ready(se_block(x2, w1, b1, w2, b2, act_type="relu",
                                          hw_tile=128))
    ref2 = se_block_ref(x2, w1, b1, w2, b2, act_type="relu")
    assert jnp.allclose(out2, ref2, atol=1e-5, rtol=1e-5), "two-phase mismatch"

    print("KERNEL_OK")
</pallas_src>

<mosaic_0001>
module attributes {stable_mosaic.version = 11 : i64} {
  func.func @kernel(%arg0: i32, %arg1: memref<2x16x64xf32, #tpu.memory_space<vmem>>, %arg2: memref<16x4xf32, #tpu.memory_space<vmem>>, %arg3: memref<1x4xf32, #tpu.memory_space<vmem>>, %arg4: memref<4x16xf32, #tpu.memory_space<vmem>>, %arg5: memref<1x16xf32, #tpu.memory_space<vmem>>, %arg6: memref<2x16x64xf32, #tpu.memory_space<vmem>>) attributes {dimension_semantics = [#tpu.dimension_semantics<parallel>], iteration_bounds = array<i64: 1>, scalar_prefetch = 0 : i64, scratch_operands = 0 : i64, tpu.core_type = #tpu.core_type<tc>, window_params = [{transform_indices = @transform_0, window_bounds = array<i64: 2, 16, 64>}, {pipeline_mode = #tpu.pipeline_mode<synchronous>, transform_indices = @transform_1, window_bounds = array<i64: 16, 4>}, {pipeline_mode = #tpu.pipeline_mode<synchronous>, transform_indices = @transform_2, window_bounds = array<i64: 1, 4>}, {pipeline_mode = #tpu.pipeline_mode<synchronous>, transform_indices = @transform_3, window_bounds = array<i64: 4, 16>}, {pipeline_mode = #tpu.pipeline_mode<synchronous>, transform_indices = @transform_4, window_bounds = array<i64: 1, 16>}, {transform_indices = @transform_5, window_bounds = array<i64: 2, 16, 64>}]} {
    %c0 = arith.constant 0 : index
    %c0_0 = arith.constant 0 : index
    %c0_1 = arith.constant 0 : index
    %0 = vector.load %arg1[%c0, %c0_0, %c0_1] : memref<2x16x64xf32, #tpu.memory_space<vmem>>, vector<2x16x64xf32>
    %cst = arith.constant dense<0.000000e+00> : vector<2x16xf32>
    %1 = vector.multi_reduction <add>, %0, %cst [2] : vector<2x16x64xf32> to vector<2x16xf32>
    %cst_2 = arith.constant 1.562500e-02 : f32
    %2 = vector.broadcast %cst_2 : f32 to vector<2x16xf32>
    %3 = arith.mulf %1, %2 : vector<2x16xf32>
    %c0_3 = arith.constant 0 : index
    %c0_4 = arith.constant 0 : index
    %4 = vector.load %arg2[%c0_3, %c0_4] : memref<16x4xf32, #tpu.memory_space<vmem>>, vector<16x4xf32>
    %cst_5 = arith.constant dense<0.000000e+00> : vector<2x4xf32>
    %5 = tpu.matmul %3, %4, %cst_5 {dimension_numbers = #tpu.dot_dimension_numbers<[1], [0], [0], [1], [0, 0, 1, 1], [], []>} : vector<2x16xf32>, vector<16x4xf32>, vector<2x4xf32> -> vector<2x4xf32>
    %c0_6 = arith.constant 0 : index
    %c0_7 = arith.constant 0 : index
    %6 = vector.load %arg3[%c0_6, %c0_7] : memref<1x4xf32, #tpu.memory_space<vmem>>, vector<1x4xf32>
    %7 = vector.broadcast %6 : vector<1x4xf32> to vector<2x4xf32>
    %8 = arith.addf %5, %7 : vector<2x4xf32>
    %cst_8 = arith.constant 0.000000e+00 : f32
    %9 = vector.broadcast %cst_8 : f32 to vector<2x4xf32>
    %10 = arith.maximumf %8, %9 : vector<2x4xf32>
    %c0_9 = arith.constant 0 : index
    %c0_10 = arith.constant 0 : index
    %11 = vector.load %arg4[%c0_9, %c0_10] : memref<4x16xf32, #tpu.memory_space<vmem>>, vector<4x16xf32>
    %cst_11 = arith.constant dense<0.000000e+00> : vector<2x16xf32>
    %12 = tpu.matmul %10, %11, %cst_11 {dimension_numbers = #tpu.dot_dimension_numbers<[1], [0], [0], [1], [0, 0, 1, 1], [], []>} : vector<2x4xf32>, vector<4x16xf32>, vector<2x16xf32> -> vector<2x16xf32>
    %c0_12 = arith.constant 0 : index
    %c0_13 = arith.constant 0 : index
    %13 = vector.load %arg5[%c0_12, %c0_13] : memref<1x16xf32, #tpu.memory_space<vmem>>, vector<1x16xf32>
    %14 = vector.broadcast %13 : vector<1x16xf32> to vector<2x16xf32>
    %15 = arith.addf %12, %14 : vector<2x16xf32>
    %16 = arith.negf %15 : vector<2x16xf32>
    %17 = math.exp %16 : vector<2x16xf32>
    %cst_14 = arith.constant 1.000000e+00 : f32
    %18 = vector.broadcast %cst_14 : f32 to vector<2x16xf32>
    %19 = arith.addf %18, %17 : vector<2x16xf32>
    %20 = arith.divf %18, %19 : vector<2x16xf32>
    %21 = vector.shape_cast %20 : vector<2x16xf32> to vector<2x16x1xf32>
    %22 = vector.broadcast %21 : vector<2x16x1xf32> to vector<2x16x64xf32>
    %23 = arith.mulf %0, %22 : vector<2x16x64xf32>
    %c0_15 = arith.constant 0 : index
    %c0_16 = arith.constant 0 : index
    %c0_17 = arith.constant 0 : index
    %24 = vector.load %arg6[%c0_15, %c0_16, %c0_17] : memref<2x16x64xf32, #tpu.memory_space<vmem>>, vector<2x16x64xf32>
    tpu.vector_store %arg6[%c0_15, %c0_16, %c0_17], %23 {strides = array<i32>} : memref<2x16x64xf32, #tpu.memory_space<vmem>>, vector<2x16x64xf32>,
    return
  }
  func.func @transform_0(%arg0: i32) -> (i32, i32, i32) {
    %c0_i32 = arith.constant 0 : i32
    %c0_i32_0 = arith.constant 0 : i32
    %c0_i32_1 = arith.constant 0 : i32
    return %arg0, %c0_i32, %c0_i32_0 : i32, i32, i32
  }
  func.func @transform_1(%arg0: i32) -> (i32, i32) {
    %c0_i32 = arith.constant 0 : i32
    %c0_i32_0 = arith.constant 0 : i32
    %c0_i32_1 = arith.constant 0 : i32
    return %c0_i32, %c0_i32_0 : i32, i32
  }
  func.func @transform_2(%arg0: i32) -> (i32, i32) {
    %c0_i32 = arith.constant 0 : i32
    %c0_i32_0 = arith.constant 0 : i32
    %c0_i32_1 = arith.constant 0 : i32
    return %c0_i32, %c0_i32_0 : i32, i32
  }
  func.func @transform_3(%arg0: i32) -> (i32, i32) {
    %c0_i32 = arith.constant 0 : i32
    %c0_i32_0 = arith.constant 0 : i32
    %c0_i32_1 = arith.constant 0 : i32
    return %c0_i32, %c0_i32_0 : i32, i32
  }
  func.func @transform_4(%arg0: i32) -> (i32, i32) {
    %c0_i32 = arith.constant 0 : i32
    %c0_i32_0 = arith.constant 0 : i32
    %c0_i32_1 = arith.constant 0 : i32
    return %c0_i32, %c0_i32_0 : i32, i32
  }
  func.func @transform_5(%arg0: i32) -> (i32, i32, i32) {
    %c0_i32 = arith.constant 0 : i32
    %c0_i32_0 = arith.constant 0 : i32
    %c0_i32_1 = arith.constant 0 : i32
    return %arg0, %c0_i32, %c0_i32_0 : i32, i32, i32
  }
}

</mosaic_0001>

<bundles_post_ra>
// kernel: tpu_custom_call.1
= control target key start
LH: loop header
LB: loop body
LE: loop exit
PB: predicated region body
PF: predicated region fallthrough
CT: control target
= control target key end

     0   :  { %10 = vsyncpa [#allocation3], 0  ;;  %s497_s0 = inlined_call_operand.hbm [shape: f32[2,16,64], index: 0, kind: input, shape index: {}]   ;;  %s498_s1 = inlined_call_operand.vmem [shape: f32[16,4], index: 1, kind: input, shape index: {}]   ;;  %s499_s2 = inlined_call_operand.vmem [shape: f32[1,4], index: 2, kind: input, shape index: {}]   ;;  %s500_s3 = inlined_call_operand.vmem [shape: f32[4,16], index: 3, kind: input, shape index: {}]   ;;  %s501_s4 = inlined_call_operand.vmem [shape: f32[1,16], index: 4, kind: input, shape index: {}]   ;;  %s502_s5 = inlined_call_operand.hbm [shape: f32[2,16,64], index: 5, kind: output, shape index: {}]  }
   0x1   :  { %11 = vsyncpa [#allocation4], 0  ;;  %s391_s18 = smov [#allocation2]   ;;  %s343_s22 = scalar_lea.hbm %s497_s0, 512 }
   0x2   :  { %s17_s19 = sshll.u32 %s391_s18, 4  ;;  %p344_p0 = scmp.ne.s32.totalorder %s497_s0, %s343_s22  ;;  %s18_s19 = int_to_ptr.vmem [resolvable:$true] %s17_s19 }
   0x3   :  { %p347_p1 = scmp.lt.u32.totalorder %s343_s22, %s497_s0 }
   0x5   :  { %p349_p2 = pnand %p347_p1, %p344_p0 }
   0x7   :  { %352 = shalt.err (!%p349_p2)
}
   0x8   :  { %s353_s27 = scalar_lea.vmem %s18_s19, 512  ;;  %p358_p4 = scmp.lt.s32.totalorder %s18_s19, %s18_s19 }
   0x9   :  { %p354_p3 = scmp.ne.s32.totalorder %s18_s19, %s353_s27  ;;  %p359_p5 = scmp.lt.s32.totalorder %s353_s27, %s353_s27 }
   0xb   :  { %p360_p6 = por %p359_p5, %p358_p4 }
   0xd   :  { %p361_p7 = pnand %p360_p6, %p354_p3 }
   0xf   :  { %364 = shalt.err (!%p361_p7)
}
  0x10   :  { %s392_s28 = smov 128   ;;  %s393_s29 = smov 8  }
  0x11   :  { %23 = dma.hbm_to_vmem [thread:$0]  %s497_s0, 512, %s18_s19, [#allocation3], %s392_s28, %s392_s28, %s393_s29  }
  0x12   :  { %387 = dma.done.wait [#allocation3], 512  }
  0x13   :  { %388 = vsyncadd [#allocation3], 4294966784  ;;  %vm39_vm0 = vcmask 523264   ;;  %v443_v0 = vld [vmem:[#allocation2 + $0x10] sm:$0xff]  ;;  %v445_v1 = vld [vmem:[#allocation2] sm:$0xff]  ;;  %v394_v11 = vmov 0.0|0.0   ;;  %v69_v13 = vlaneseq }
  0x14   :  { %v447_v2 = vld [vmem:[#allocation2 + $0x18] sm:$0xff]  ;;  %v46_v3 = vsel %vm39_vm0, %v443_v0, 0.0  ;;  %v40_v4 = vsel %vm39_vm0, %v445_v1, 0.0  ;;  %v453_v5 = vld [vmem:[#allocation2 + $0x8] sm:$0xff]  ;;  %v56_v8 = vld [vmem:[%s498_s1] sm:$0xff]  ;;  %329 = vmatprep.subr.bf16.mxu0 %v394_v11  ;;  %vm395_vm1 = vmmov 0  }
  0x15   :  { %47 = vadd.xlane.f32.xlu1 %v46_v3  ;;  %41 = vadd.xlane.f32.xlu0 %v40_v4  ;;  %v49_v6 = vsel %vm39_vm0, %v447_v2, 0.0  ;;  %v43_v7 = vsel %vm39_vm0, %v453_v5, 0.0  ;;  %v57_v9 = vld [vmem:[%s498_s1 + $0x8] sm:$0xff]  ;;  %v396_v12 = vmov 0.0   ;;  %v70_v14 = vand.u32 127, %v69_v13 }
  0x16   :  { %v330_v10 = vpack.c.bf16 %v57_v9, %v56_v8  ;;  %321 = vmatprep.mubr.msk.f32.mxu0 %vm395_vm1, %v396_v12  ;;  %324 = vmatprep.subr.mxu1 %v396_v12  ;;  %v72_v15 = vshrl.u32 %v69_v13, 7  ;;  %vm80_vm2 = vcmask 130112   ;;  %vm91_vm3 = vcmask 1041409   ;;  %v167_v34 = vld [vmem:[%s500_s3] sm:$0xf] }
  0x17   :  { %326 = vmatprep.mubr.msk.f32.mxu1 %vm395_vm1, %v396_v12  ;;  %v75_v16 = vadd.s32 4294967288, %v70_v14  ;;  %vm93_vm4 = vcmask 130048   ;;  %vm179_vm5 = vcmask 1043456   ;;  %v306_v35 = vld [vmem:[%s499_s2] ss:$0 sm:$0xff]  ;;  %vm175_vm6 = vcmask 31744  }
  0x18   :  { %331 = vmatpush3.bf16.msra.mxu0 %v330_v10  ;;  %v73_v19 = vsub.s32 %v70_v14, %v72_v15  ;;  %325 = vmatpush3.msk.msra.mxu1 %vm179_vm5, %v167_v34  ;;  %v308_v40 = vld [vmem:[%s501_s4] ss:$0 sm:$0xff]  ;;  %v261_v47 = vsub.s32 0, %v72_v15  ;;  %v272_v50 = vsub.s32 1, %v72_v15  ;;  %s397_s2 = smov [#allocation5]  }
  0x19   :  { %50 = vadd.xlane.f32.xlu1 %v49_v6  ;;  %44 = vadd.xlane.f32.xlu0 %v43_v7  ;;  %v78_v22 = vsub.s32 %v75_v16, %v72_v15  ;;  %s294_s3 = sshll.u32 %s397_s2, 4  ;;  %s295_s3 = int_to_ptr.vmem [resolvable:$true] %s294_s3 }
  0x1a   :  { %s365_s4 = scalar_lea.vmem %s295_s3, 512  ;;  %p370_p9 = scmp.lt.s32.totalorder %s295_s3, %s295_s3 }
  0x1b   :  { %p366_p8 = scmp.ne.s32.totalorder %s295_s3, %s365_s4  ;;  %p371_p10 = scmp.lt.s32.totalorder %s365_s4, %s365_s4 }
  0x1d   :  { %p372_p11 = por %p371_p10, %p370_p9 }
  0x1f   :  { %p373_p12 = pnand %p372_p11, %p366_p8 }
  0xa2   :  { %v48_v17 = vpop.xlane.xlu1 %47  ;;  %v42_v18 = vpop.xlane.xlu0 %41 }
  0xa3   :  { %v54_v20 = vmul.f32 0.015625, %v48_v17  ;;  %v52_v21 = vmul.f32 0.015625, %v42_v18 }
  0xa5   :  { %v85_v27 = vrot.slane %v54_v20, %v73_v19  ;;  %v74_v28 = vrot.slane %v52_v21, %v73_v19 }
  0xa6   :  { %v51_v23 = vpop.xlane.xlu1 %50  ;;  %v45_v24 = vpop.xlane.xlu0 %44 }
  0xa7   :  { %v55_v25 = vmul.f32 0.015625, %v51_v23  ;;  %v53_v26 = vmul.f32 0.015625, %v45_v24 }
  0xa9   :  { %v89_v29 = vrot.slane %v55_v25, %v78_v22  ;;  %v79_v30 = vrot.slane %v53_v26, %v78_v22 }
  0xab   :  { %v81_v31 = vsel %vm80_vm2, %v79_v30, %v74_v28  ;;  %v90_v32 = vsel %vm80_vm2, %v89_v29, %v85_v27 }
  0xac   :  { %v92_v33 = vsel %vm91_vm3, %v90_v32, %v81_v31 }
  0xad   :  { %322 = vmatmul.mubr.msk.f32.vlgmr.msra.gmra.mrb[0].mxu0 %vm93_vm4, %v92_v33 }
 0x180   :  { %v162_v36 = vpop.f32.mrb[0].mxu0 }
 0x181   :  { %v163_v37 = vadd.f32 %v306_v35, %v162_v36  ;;  %v323_v38 = vpop.f32.mrb[1].mxu0 }
 0x183   :  { %v166_v39 = vmax.f32 %v163_v37, 0.0 }
 0x185   :  { %327 = vmatmul.mubr.msk.f32.vlgmr.msra.gmra.mrb[0].mxu1 %vm175_vm6, %v166_v39 }
 0x258   :  { %v249_v41 = vpop.f32.mrb[0].mxu1 }
 0x259   :  { %v250_v42 = vadd.f32 %v308_v40, %v249_v41  ;;  %v328_v43 = vpop.f32.mrb[1].mxu1 }
 0x25b   :  { %v311_v44 = vmul.f32 -1.442695, %v250_v42 }
 0x25d   :  { %339 = vpow2.f32 %v311_v44 }
 0x267   :  { %v340_v45 = vpop.eup %339 }
 0x268   :  { %v256_v46 = vadd.f32 1.0, %v340_v45 }
 0x26a   :  { %341 = vrcp.f32 %v256_v46 }
 0x274   :  { %v342_v48 = vpop.eup %341 }
 0x275   :  { %v262_v49 = vrot.slane %v342_v48, %v261_v47  ;;  %v273_v51 = vrot.slane %v342_v48, %v272_v50 }
 0x277   :  { %268 = vbcast.lane.b32.xlu1 %v262_v49, 264  ;;  %264 = vbcast.lane.b32.xlu0 %v262_v49, 256 }
 0x27b   :  { %275 = vbcast.lane.b32.xlu1 %v273_v51, 256 }
 0x27f   :  { %279 = vbcast.lane.b32.xlu1 %v273_v51, 264 }
 0x2e9   :  { %v269_v52 = vpop.permute.xlu1 %268  ;;  %v265_v53 = vpop.permute.xlu0 %264 }
 0x2ea   :  { %v282_v54 = vmul.f32 %v269_v52, %v453_v5  ;;  %v281_v55 = vmul.f32 %v265_v53, %v445_v1 }
 0x2ec   :  { %286 = vst.msk [vmem:[#allocation5 + $0x8] sm:$0xff] %vm39_vm0, %v282_v54  ;;  %285 = vst.msk [vmem:[#allocation5] sm:$0xff] %vm39_vm0, %v281_v55 }
 0x2ed   :  { %v276_v56 = vpop.permute.xlu1 %275 }
 0x2ee   :  { %v283_v57 = vmul.f32 %v276_v56, %v443_v0 }
 0x2f0   :  { %287 = vst.msk [vmem:[#allocation5 + $0x10] sm:$0xff] %vm39_vm0, %v283_v57 }
 0x2f1   :  { %v280_v58 = vpop.permute.xlu1 %279 }
 0x2f2   :  { %v284_v59 = vmul.f32 %v280_v58, %v447_v2 }
 0x2f4   :  { %288 = vst.msk [vmem:[#allocation5 + $0x18] sm:$0xff] %vm39_vm0, %v284_v59 }
 0x2f5   :  { %376 = shalt.err (!%p373_p12)
}
 0x2f6   :  { %s377_s17 = scalar_lea.hbm %s502_s5, 512 }
 0x2f7   :  { %p378_p13 = scmp.ne.s32.totalorder %s502_s5, %s377_s17  ;;  %p381_p0 = scmp.lt.u32.totalorder %s377_s17, %s502_s5 }
 0x2f9   :  { %p383_p1 = pnand %p381_p0, %p378_p13 }
 0x2fb   :  { %386 = shalt.err (!%p383_p1)
}
 0x2fc   :  { %300 = dma.vmem_to_hbm [thread:$0]  %s295_s3, 512, %s502_s5, [#allocation4], %s392_s28, %s392_s28, %s393_s29  }
 0x2fd   :  { %389 = dma.done.wait [#allocation4], 512  }
 0x2fe   :  { %390 = vsyncadd [#allocation4], 4294966784 }
 0x2ff   :  { %304 = vsyncpa [#allocation3], 1 }
 0x300   :  { %305 = vsyncpa [#allocation4], 1 }

</bundles_post_ra>
